<compile_context>
chip_gen: v5e
topology: v5e:2x2
jax: 0.10.0
libtpu: 0.0.40
codegen_flags: <defaults>
</compile_context>

<pallas_src>
import functools

import numpy as np
import jax
import jax.numpy as jnp
from jax.experimental import pallas as pl
from jax.experimental.pallas import tpu as pltpu


def _tpu_vmem_limit_bytes() -> int:
    """Generation-aware VMEM compiler limit: 3/4 of physical VMEM
    (v5e/v6e 128 MiB -> 96 MiB, v7x 64 MiB -> 48 MiB); conservative fallback."""
    cap = 64 * 1024 * 1024
    try:
        info = pltpu.get_tpu_info()
        cap = int(getattr(info, "vmem_capacity_bytes", cap)) or cap
    except Exception:
        pass
    return (cap * 3) // 4


@functools.lru_cache(maxsize=None)
def _interp_matrix(in_size: int, out_size: int, scale_factor: float) -> np.ndarray:
    """(out_size, in_size) row-stochastic matrix reproducing PyTorch's
    upsample_trilinear3d along one axis (align_corners=False with an explicit
    scale_factor => coordinate scale = 1/scale_factor)."""
    w = np.zeros((out_size, in_size), dtype=np.float32)
    coord = 1.0 / scale_factor
    for dst in range(out_size):
        src = max(coord * (dst + 0.5) - 0.5, 0.0)
        i0 = min(int(np.floor(src)), in_size - 1)
        i1 = min(i0 + 1, in_size - 1)
        lam = min(max(src - i0, 0.0), 1.0)
        w[dst, i0] += 1.0 - lam
        w[dst, i1] += lam
    return w


def _resample_hw(vol, whT, wwT):
    """(T, H, W) f32 -> (T, Ho, Wo) f32 via two 2-D MXU matmuls.
    bf16 operands with f32 accumulation; reshapes only merge/split leading dims
    and the only transposes are last-two-dim swaps (XLU)."""
    t_, h, w = vol.shape
    ho = whT.shape[1]
    wo = wwT.shape[1]
    t = jnp.dot(vol.astype(jnp.bfloat16).reshape(t_ * h, w), wwT,
                preferred_element_type=jnp.float32).reshape(t_, h, wo)
    t = jnp.swapaxes(t, 1, 2)                                   # (T, Wo, H)
    t = jnp.dot(t.astype(jnp.bfloat16).reshape(t_ * wo, h), whT,
                preferred_element_type=jnp.float32).reshape(t_, wo, ho)
    return jnp.swapaxes(t, 1, 2)                                # (T, Ho, Wo)


def _halve_kernel(x_ref, whT_ref, wwT_ref, o_ref):
    """scale_factor == 0.5 fast path: exact 2-tap pair averaging along D (VPU),
    then H/W resampling on the MXU.  One independent output tile per grid step."""
    td2, h, w = x_ref.shape
    tdo = td2 // 2
    xp = x_ref[...].reshape(tdo, 2, h, w)                       # leading-dim split
    xs = (xp[:, 0] + xp[:, 1]) * 0.5                            # VPU pair average (f32)
    o_ref[...] = _resample_hw(xs, whT_ref[...], wwT_ref[...]).astype(o_ref.dtype)


def _make_windowed_kernel(nb: int, td: int, d_full: int, need_mask: bool):
    """General-scale kernel: contract the pre-windowed D weights against the NB
    fetched input blocks of this output-D tile, then resample H and W."""

    def kernel(blk_ref, wd_ref, *args):
        x_refs = args[:nb]
        whT_ref, wwT_ref, o_ref = args[nb], args[nb + 1], args[nb + 2]
        i = pl.program_id(0)

        wd = wd_ref[0]                                          # (TDo, NB*td) f32
        tdo = wd.shape[0]
        _, h, w = x_refs[0].shape

        # (1) D contraction over the 2-tap window (small, kept in f32; the big
        #     H/W matmuls below run with bf16 MXU operands).  Weights are
        #     pre-oriented per tile -> no in-kernel transpose.
        acc = jnp.zeros((tdo, h, w), jnp.float32)
        for j in range(nb):
            xj = x_refs[j][...]
            if need_mask:
                # Ragged last input block: zero the out-of-range planes instead
                # of trusting garbage * 0 (garbage could be inf/NaN).
                valid = jnp.minimum(td, d_full - blk_ref[i, j] * td)
                rows = jax.lax.broadcasted_iota(jnp.int32, (td, 1, 1), 0)
                xj = jnp.where(rows < valid, xj, 0.0)
            acc = acc + jnp.einsum('khw,ok->ohw', xj,
                                   wd[:, j * td:(j + 1) * td],
                                   preferred_element_type=jnp.float32)

        # (2)+(3) W and H contractions on the MXU.
        o_ref[...] = _resample_hw(acc, whT_ref[...], wwT_ref[...]).astype(o_ref.dtype)

    return kernel


def _window_tables(d_in, d_out, scale_factor, tdo, td, n_do):
    """Per-output-D-tile input-block indices (n_do, NB) int32 and windowed D
    weights (n_do, TDo, NB*td) f32; weight columns are relative to each tile's
    first fetched block, so the kernel never touches planes outside its window."""
    coord = 1.0 / scale_factor
    n_blocks = (d_in + td - 1) // td
    taps = []
    for dst in range(d_out):
        src = max(coord * (dst + 0.5) - 0.5, 0.0)
        i0 = min(int(np.floor(src)), d_in - 1)
        i1 = min(i0 + 1, d_in - 1)
        lam = min(max(src - i0, 0.0), 1.0)
        taps.append((i0, 1.0 - lam, i1, lam))

    starts, nb = [], 1
    for i in range(n_do):
        dsts = range(i * tdo, min((i + 1) * tdo, d_out))
        lo = min(taps[dst][0] for dst in dsts)
        hi = max(taps[dst][2] for dst in dsts)
        b_lo, b_hi = lo // td, hi // td
        starts.append(b_lo)
        nb = max(nb, b_hi - b_lo + 1)

    blk = np.zeros((n_do, nb), dtype=np.int32)
    wdw = np.zeros((n_do, tdo, nb * td), dtype=np.float32)
    for i, b_lo in enumerate(starts):
        blk[i, :] = np.minimum(b_lo + np.arange(nb), n_blocks - 1)
        for r in range(tdo):
            dst = i * tdo + r
            if dst >= d_out:
                break                                   # padded rows stay zero
            i0, w0, i1, w1 = taps[dst]
            wdw[i, r, i0 - b_lo * td] += w0
            wdw[i, r, i1 - b_lo * td] += w1
    return blk, wdw, nb


def downsample(x, scale_factor: float):
    """x: (D, H, W) -> (1, D', H', W'), matching torch DownSample.forward."""
    if scale_factor == 1:
        return x[None, ...]

    D, H, W = x.shape
    Do = int(np.floor(D * scale_factor))
    Ho = int(np.floor(H * scale_factor))
    Wo = int(np.floor(W * scale_factor))

    vmem_limit = _tpu_vmem_limit_bytes()
    usable = int(vmem_limit * 0.6)          # headroom for Mosaic scratch/relayouts
    in_item = x.dtype.itemsize
    out_item = in_item
    plane_in = H * W * in_item
    fixed = 2 * (H * Ho + W * Wo) * 2       # resident bf16 interp matrices (x2 slack)

    # Pre-transposed 1-D interpolation matrices for H and W (bf16 MXU operands).
    whT = jnp.asarray(np.ascontiguousarray(_interp_matrix(H, Ho, scale_factor).T),
                      dtype=jnp.bfloat16)   # (H, Ho)
    wwT = jnp.asarray(np.ascontiguousarray(_interp_matrix(W, Wo, scale_factor).T),
                      dtype=jnp.bfloat16)   # (W, Wo)

    cparams = pltpu.CompilerParams(dimension_semantics=("parallel",),
                                   vmem_limit_bytes=vmem_limit)

    if scale_factor == 0.5:
        # ---- fast path: independent output-D tiles, exact pair averaging ----
        per = (4 * plane_in                              # (2*TDo) input planes, x2 buf
               + 2 * Ho * Wo * out_item                  # output tile, x2 buf
               + H * W * 6 + H * Wo * 10 + Wo * Ho * 8)  # matmul intermediates
        budget_tdo = max(1, (usable - fixed) // per)
        target_tdo = max(1, pl.cdiv(Do, min(4, Do)))     # >=4 steps -> >=2 per TC (v7x)
        tdo = max(1, min(Do, budget_tdo, target_tdo))
        n_i = pl.cdiv(Do, tdo)

        out = pl.pallas_call(
            _halve_kernel,
            out_shape=jax.ShapeDtypeStruct((Do, Ho, Wo), x.dtype),
            grid=(n_i,),
            in_specs=[
                pl.BlockSpec((2 * tdo, H, W), lambda i: (i, 0, 0)),
                pl.BlockSpec((H, Ho), lambda i: (0, 0)),
                pl.BlockSpec((W, Wo), lambda i: (0, 0)),
            ],
            out_specs=pl.BlockSpec((tdo, Ho, Wo), lambda i: (i, 0, 0)),
            compiler_params=cparams,
        )(x, whT, wwT)
        return out[None, ...]

    # ---- general path: parallel grid over output-D tiles, windowed input fetch ----
    coord = 1.0 / scale_factor

    # Input-D block granularity for the window fetch (small DMA unit; planes stay
    # whole so the last two block dims always equal the full array dims).
    td = max(1, min(D, 8))
    while td > 1 and td * plane_in > 2 * 1024 * 1024:
        td = max(1, td // 2)

    def footprint(tdo):
        win = int(np.ceil(coord * tdo)) + 2
        nb_ub = max(1, (win + 2 * td - 2) // td)
        return (fixed
                + 2 * nb_ub * td * plane_in              # NB double-buffered blocks
                + 2 * tdo * Ho * Wo * out_item           # double-buffered output tile
                + 2 * tdo * nb_ub * td * 4               # windowed D weights (f32)
                + tdo * (H * W * 6 + H * Wo * 10 + Wo * Ho * 8))   # intermediates

    tdo = max(1, pl.cdiv(Do, min(4, Do)))                # aim for >=4 parallel tiles
    while tdo > 1 and footprint(tdo) > usable:
        tdo = max(1, (tdo * 3) // 4)
    n_do = pl.cdiv(Do, tdo)

    blk_np, wdw_np, nb = _window_tables(D, Do, scale_factor, tdo, td, n_do)
    blk_idx = jnp.asarray(blk_np)                        # (n_do, nb) int32, SMEM prefetch
    wdwin = jnp.asarray(wdw_np)                          # (n_do, tdo, nb*td) f32
    need_mask = (D % td) != 0

    def _x_index_map(j):
        def imap(i, blk):
            return (blk[i, j], 0, 0)
        return imap

    grid_spec = pltpu.PrefetchScalarGridSpec(
        num_scalar_prefetch=1,
        grid=(n_do,),
        in_specs=(
            [pl.BlockSpec((1, tdo, nb * td), lambda i, blk: (i, 0, 0))]
            + [pl.BlockSpec((td, H, W), _x_index_map(j)) for j in range(nb)]
            + [pl.BlockSpec((H, Ho), lambda i, blk: (0, 0)),
               pl.BlockSpec((W, Wo), lambda i, blk: (0, 0))]),
        out_specs=pl.BlockSpec((tdo, Ho, Wo), lambda i, blk: (i, 0, 0)),
    )

    out = pl.pallas_call(
        _make_windowed_kernel(nb, td, D, need_mask),
        out_shape=jax.ShapeDtypeStruct((Do, Ho, Wo), x.dtype),
        grid_spec=grid_spec,
        compiler_params=cparams,
    )(blk_idx, wdwin, *([x] * nb), whT, wwT)
    return out[None, ...]


if __name__ == "__main__":
    key = jax.random.PRNGKey(0)
    k1, k2 = jax.random.split(key)

    # --- scale_factor = 0.5: the common DownSample config (VPU pair-average path) ---
    x = jax.random.normal(k1, (8, 16, 16), dtype=jnp.float32)
    x_np = np.asarray(x)
    y = downsample(x, 0.5)
    jax.block_until_ready(y)
    assert y.shape == (1, 4, 8, 8), y.shape
    ref = x_np.reshape(4, 2, 16, 16).mean(1)
    ref = ref.reshape(4, 8, 2, 16).mean(2)
    ref = ref.reshape(4, 8, 8, 2).mean(3)
    err = float(np.max(np.abs(np.asarray(y[0]) - ref)))
    # tolerance accounts for bf16 MXU operands (f32 accumulation)
    assert err < 3e-2, f"halve-path max abs err {err}"

    # --- non-trivial scale + ragged D: windowed general path (multi-block windows,
    #     masked ragged last input block, partial output tile) ---
    x2 = jax.random.normal(k2, (23, 16, 16), dtype=jnp.float32)
    x2_np = np.asarray(x2)
    y2 = downsample(x2, 0.75)
    jax.block_until_ready(y2)
    assert y2.shape == (1, 17, 12, 12), y2.shape
    ref2 = np.einsum('gd,fh,ew,dhw->gfe',
                     _interp_matrix(23, 17, 0.75),
                     _interp_matrix(16, 12, 0.75),
                     _interp_matrix(16, 12, 0.75),
                     x2_np)
    err2 = float(np.max(np.abs(np.asarray(y2[0]) - ref2)))
    assert err2 < 6e-2, f"general-path max abs err {err2}"

    print("KERNEL_OK")
</pallas_src>

<mosaic_0001>
module attributes {stable_mosaic.version = 11 : i64} {
  func.func @_halve_kernel(%arg0: i32, %arg1: memref<2x16x16xf32, #tpu.memory_space<vmem>>, %arg2: memref<16x8xbf16, #tpu.memory_space<vmem>>, %arg3: memref<16x8xbf16, #tpu.memory_space<vmem>>, %arg4: memref<1x8x8xf32, #tpu.memory_space<vmem>>) attributes {dimension_semantics = [#tpu.dimension_semantics<parallel>], iteration_bounds = array<i64: 4>, scalar_prefetch = 0 : i64, scratch_operands = 0 : i64, tpu.core_type = #tpu.core_type<tc>, window_params = [{transform_indices = @transform_0, window_bounds = array<i64: 2, 16, 16>}, {pipeline_mode = #tpu.pipeline_mode<synchronous>, transform_indices = @transform_1, window_bounds = array<i64: 16, 8>}, {pipeline_mode = #tpu.pipeline_mode<synchronous>, transform_indices = @transform_2, window_bounds = array<i64: 16, 8>}, {transform_indices = @transform_3, window_bounds = array<i64: 1, 8, 8>}]} {
    %c0 = arith.constant 0 : index
    %c0_0 = arith.constant 0 : index
    %c0_1 = arith.constant 0 : index
    %0 = vector.load %arg1[%c0, %c0_0, %c0_1] : memref<2x16x16xf32, #tpu.memory_space<vmem>>, vector<2x16x16xf32>
    %1 = vector.shape_cast %0 : vector<2x16x16xf32> to vector<1x2x16x16xf32>
    %2 = vector.extract_strided_slice %1 {offsets = [0, 0, 0, 0], sizes = [1, 1, 16, 16], strides = [1, 1, 1, 1]} : vector<1x2x16x16xf32> to vector<1x1x16x16xf32>
    %3 = vector.shape_cast %2 : vector<1x1x16x16xf32> to vector<1x16x16xf32>
    %4 = vector.extract_strided_slice %1 {offsets = [0, 1, 0, 0], sizes = [1, 1, 16, 16], strides = [1, 1, 1, 1]} : vector<1x2x16x16xf32> to vector<1x1x16x16xf32>
    %5 = vector.shape_cast %4 : vector<1x1x16x16xf32> to vector<1x16x16xf32>
    %6 = arith.addf %3, %5 : vector<1x16x16xf32>
    %cst = arith.constant 5.000000e-01 : f32
    %7 = vector.broadcast %cst : f32 to vector<1x16x16xf32>
    %8 = arith.mulf %6, %7 : vector<1x16x16xf32>
    %c0_2 = arith.constant 0 : index
    %c0_3 = arith.constant 0 : index
    %9 = vector.load %arg2[%c0_2, %c0_3] : memref<16x8xbf16, #tpu.memory_space<vmem>>, vector<16x8xbf16>
    %c0_4 = arith.constant 0 : index
    %c0_5 = arith.constant 0 : index
    %10 = vector.load %arg3[%c0_4, %c0_5] : memref<16x8xbf16, #tpu.memory_space<vmem>>, vector<16x8xbf16>
    %11 = arith.truncf %8 : vector<1x16x16xf32> to vector<1x16x16xbf16>
    %12 = vector.shape_cast %11 : vector<1x16x16xbf16> to vector<16x16xbf16>
    %cst_6 = arith.constant dense<0.000000e+00> : vector<16x8xf32>
    %13 = tpu.matmul %12, %10, %cst_6 {dimension_numbers = #tpu.dot_dimension_numbers<[1], [0], [0], [1], [0, 0, 1, 1], [], []>} : vector<16x16xbf16>, vector<16x8xbf16>, vector<16x8xf32> -> vector<16x8xf32>
    %14 = vector.shape_cast %13 : vector<16x8xf32> to vector<1x16x8xf32>
    %15 = tpu.transpose %14, [0, 2, 1] : vector<1x16x8xf32> -> vector<1x8x16xf32>
    %16 = arith.truncf %15 : vector<1x8x16xf32> to vector<1x8x16xbf16>
    %17 = vector.shape_cast %16 : vector<1x8x16xbf16> to vector<8x16xbf16>
    %cst_7 = arith.constant dense<0.000000e+00> : vector<8x8xf32>
    %18 = tpu.matmul %17, %9, %cst_7 {dimension_numbers = #tpu.dot_dimension_numbers<[1], [0], [0], [1], [0, 0, 1, 1], [], []>} : vector<8x16xbf16>, vector<16x8xbf16>, vector<8x8xf32> -> vector<8x8xf32>
    %19 = vector.shape_cast %18 : vector<8x8xf32> to vector<1x8x8xf32>
    %20 = tpu.transpose %19, [0, 2, 1] : vector<1x8x8xf32> -> vector<1x8x8xf32>
    %c0_8 = arith.constant 0 : index
    %c0_9 = arith.constant 0 : index
    %c0_10 = arith.constant 0 : index
    %21 = vector.load %arg4[%c0_8, %c0_9, %c0_10] : memref<1x8x8xf32, #tpu.memory_space<vmem>>, vector<1x8x8xf32>
    tpu.vector_store %arg4[%c0_8, %c0_9, %c0_10], %20 {strides = array<i32>} : memref<1x8x8xf32, #tpu.memory_space<vmem>>, vector<1x8x8xf32>,
    return
  }
  func.func @transform_0(%arg0: i32) -> (i32, i32, i32) {
    %c0_i32 = arith.constant 0 : i32
    %c0_i32_0 = arith.constant 0 : i32
    %c0_i32_1 = arith.constant 0 : i32
    return %arg0, %c0_i32, %c0_i32_0 : i32, i32, i32
  }
  func.func @transform_1(%arg0: i32) -> (i32, i32) {
    %c0_i32 = arith.constant 0 : i32
    %c0_i32_0 = arith.constant 0 : i32
    %c0_i32_1 = arith.constant 0 : i32
    return %c0_i32, %c0_i32_0 : i32, i32
  }
  func.func @transform_2(%arg0: i32) -> (i32, i32) {
    %c0_i32 = arith.constant 0 : i32
    %c0_i32_0 = arith.constant 0 : i32
    %c0_i32_1 = arith.constant 0 : i32
    return %c0_i32, %c0_i32_0 : i32, i32
  }
  func.func @transform_3(%arg0: i32) -> (i32, i32, i32) {
    %c0_i32 = arith.constant 0 : i32
    %c0_i32_0 = arith.constant 0 : i32
    %c0_i32_1 = arith.constant 0 : i32
    return %arg0, %c0_i32, %c0_i32_0 : i32, i32, i32
  }
}

</mosaic_0001>

<bundles_post_ra>
// kernel: tpu_custom_call.1
= control target key start
LH: loop header
LB: loop body
LE: loop exit
PB: predicated region body
PF: predicated region fallthrough
CT: control target
= control target key end

     0   :  { %8 = vsyncpa [#allocation3], 0  ;;  %s741_s0 = inlined_call_operand.hbm [shape: f32[8,16,16], index: 0, kind: input, shape index: {}]   ;;  %s742_s1 = inlined_call_operand.vmem [shape: bf16[16,8], index: 1, kind: input, shape index: {}]   ;;  %s743_s2 = inlined_call_operand.vmem [shape: bf16[16,8], index: 2, kind: input, shape index: {}]   ;;  %s744_s3 = inlined_call_operand.hbm [shape: f32[4,8,8], index: 3, kind: output, shape index: {}]  }
   0x1   :  { %10 = vsyncpa [#allocation3 + $0x1], 0 }
   0x2   :  { %11 = vsyncpa [#allocation4], 0 }
   0x3   :  { %13 = vsyncpa [#allocation4 + $0x1], 0  ;;  %s609_s12 = smov 0   ;;  %s611_s13 = smov 0  }
   0x4   :  { %s613_s14 = smov 0   ;;  %s615_s15 = smov 0  }
   0x5 LB: > { %s630_s16 = sadd.s32 4294967295, %s585_s15   ;;  %s412_s17 = sadd.s32 4294967294, %s585_s15   ;;  %s585_s15 = sphi %s615_s15, %s753_s15   ;;  %s581_s14 = sphi %s613_s14, %s752_s14   ;;  %s577_s13 = sphi %s611_s13, %s751_s13   ;;  %s573_s12 = sphi %s609_s12, %s750_s12  }
   0x6   : > { %s634_s18 = sadd.s32 1, %s585_s15   ;;  %s26_s19 = sadd.s32 1, %s581_s14 }
   0x7   : > { %s23_s20 = ssub.s32 %s585_s15, %s634_s18  ;;  %p33_p0 = scmp.ne.s32.totalorder %s581_s14, %s577_s13 }
   0x8   : > { %p24_p1 = scmp.eq.s32.totalorder %s23_s20, 0  ;;  %p34_p2 = scmp.eq.s32.totalorder %s585_s15, 0 }
   0x9   : > { %p39_p3 = scmp.ne.s32.totalorder %s577_s13, %s573_s12  ;;  %p40_p4 = scmp.eq.s32.totalorder %s630_s16, 0 }
   0xa   : > { %s646_s21 = scalar_select %p24_p1, %s581_s14, %s26_s19  }
   0xb   : > { %p648_p5 = por %p34_p2, %p33_p0  ;;  %p652_p6 = por %p40_p4, %p39_p3 }
   0xc   : > { %p105_p7 = scmp.eq.s32.totalorder %s630_s16, 3  ;;  %p111_p8 = scmp.eq.s32.totalorder %s412_s17, 3 }
   0xd   : > { %p452_p9 = scmp.lt.s32.totalorder %s585_s15, 4  ;;  %s137_s26 = sand.u32 1, %s581_s14  }
   0xe   : > { %p658_p10 = por %p105_p7, %p33_p0  ;;  %p662_p11 = por %p111_p8, %p39_p3 }
   0xf   : > { %s437_s27 = sshll.u32 %s585_s15, 5  ;;  %s415_s28 = sshll.u32 %s137_s26, 5 }
  0x10   : > { %s147_s4 = scalar_lea.hbm %s741_s0, %s437_s27  ;;  %s141_s6 = scalar_lea.vmem [#allocation2], %s415_s28 }
  0x11   : > { %s148_s5 = sshll.u32 %s147_s4, 4  ;;  %s150_s7 = sshll.u32 %s141_s6, 4  ;;  %s149_s5 = int_to_ptr.hbm [resolvable:$true] %s148_s5  ;;  %s151_s7 = int_to_ptr.vmem [resolvable:$true] %s150_s7 }
  0x12   : > { %p673_p12 = pnand %p452_p9, %p648_p5  ;;  %p419_p13 = scmp.ge.s32.totalorder %s585_s15, 1 }
  0x13   : > { %p158_p0 = scmp.lt.s32.totalorder %s585_s15, 5  ;;  %s138_s9 = scalar_lea.sflag [#allocation3], %s137_s26 }
  0x14   : > { %s489_s10 = sshra.s32 %s149_s5, 4  ;;  %p493_p2 = pneg %p673_p12  ;;  %s490_s10 = int_to_ptr.hbm [resolvable:$true] %s489_s10 }
  0x15   : > { %s491_s11 = scalar_lea.hbm %s490_s10, 32  ;;  %s496_s20 = scalar_lea.hbm %s741_s0, 128 }
  0x16   : > { %p492_p1 = scmp.ne.s32.totalorder %s490_s10, %s491_s11  ;;  %p497_p5 = scmp.lt.s32.totalorder %s490_s10, %s741_s0 }
  0x17   : > { %p498_p7 = scmp.lt.s32.totalorder %s496_s20, %s491_s11 }
  0x18   : > { %p494_p3 = pnand %p493_p2, %p492_p1 }
  0x19   : > { %p499_p8 = por %p498_p7, %p497_p5 }
  0x1a   : > { %p495_p4 = pneg %p494_p3 }
  0x1c   : > { %p500_p9 = pnand %p499_p8, %p495_p4 }
  0x1e   : > { %503 = shalt.err (!%p500_p9)
}
  0x1f   : > { %s587_s26 = smov 128   ;;  %s588_s28 = smov 8  }
  0x20   : > { %447 = dma.hbm_to_vmem [thread:$0]  (!%p673_p12), %s149_s5, 512, %s151_s7, %s138_s9, %s587_s26, %s587_s26, %s588_s28  }
  0x21   : > { %p159_p1 = pnand %p419_p13, %p158_p0 }
  0x22   : > { %s694_s29 = sand.u32 (!%p159_p1), 1, %s577_s13  }
  0x23   : > { %162 = sbr.rel (%p159_p1) target bundleno = 640 (0x280), region = 32  ;;  %s420_s30 = sshll.u32 (!%p159_p1), %s694_s29, 5 }
  0x24   : > { %s165_s4 = scalar_lea.sflag (!%p159_p1), [#allocation3], %s694_s29  ;;  %s168_s6 = scalar_lea.vmem (!%p159_p1), [#allocation2], %s420_s30 }
  0x28   : > { %564 = dma.done.wait (%p652_p6), %s165_s4, 512  }
  0x29   : > { %566 = vsyncadd (%p652_p6), %s165_s4, 4294966784  ;;  %v439_v0 = vld [vmem:[%s743_s2] sm:$0xff]  ;;  %v195_v2 = vld [vmem:[%s168_s6 + $0x8] sm:$0xff]  ;;  %vm219_vm0 = vcmask 130048   ;;  %s421_s9 = sshll.u32 %s694_s29, 3  ;;  %s433_s10 = sshll.u32 %s630_s16, 3 }
  0x2a   : > { %v194_v1 = vld [vmem:[%s168_s6] sm:$0xff]  ;;  %v196_v3 = vld [vmem:[%s168_s6 + $0x10] sm:$0xff]  ;;  %v197_v4 = vld [vmem:[%s168_s6 + $0x18] sm:$0xff]  ;;  %230 = vmatpush.bf16.msra.mxu0 %v439_v0  ;;  %s337_s19 = scalar_lea.hbm %s744_s3, %s433_s10  ;;  %s191_s20 = scalar_lea.vmem [#allocation5], %s421_s9  ;;  %vm324_vm1 = vcmask 64512  }
  0x2b   : > { %v198_v5 = vadd.f32 %v196_v3, %v194_v1  ;;  %v199_v6 = vadd.f32 %v197_v4, %v195_v2  ;;  %v438_v14 = vld [vmem:[%s742_s1] sm:$0xff]  ;;  %s339_s22 = sshll.u32 %s191_s20, 4  ;;  %s341_s27 = sshll.u32 %s337_s19, 4  ;;  %s340_s22 = int_to_ptr.vmem [resolvable:$true] %s339_s22  ;;  %s342_s27 = int_to_ptr.hbm [resolvable:$true] %s341_s27 }
  0x2c   : > { %286 = vmatpush.bf16.msra.mxu1 %v438_v14  ;;  %s327_s26 = scalar_lea.sflag [#allocation4], %s694_s29  ;;  %s533_s28 = sshra.s32 %s342_s27, 4  ;;  %s534_s28 = int_to_ptr.hbm [resolvable:$true] %s533_s28 }
  0x2d   : > { %v200_v7 = vmul.f32 0.5, %v198_v5  ;;  %v201_v8 = vmul.f32 0.5, %v199_v6  ;;  %s535_s30 = scalar_lea.hbm %s534_s28, 8  ;;  %s539_s6 = scalar_lea.hbm %s744_s3, 32 }
  0x2e   : > { %p536_p6 = scmp.ne.s32.totalorder %s534_s28, %s535_s30  ;;  %p540_p0 = scmp.lt.s32.totalorder %s534_s28, %s744_s3 }
  0x2f   : > { %v206_v9 = vpack.c.bf16 %v200_v7, %v200_v7  ;;  %v207_v10 = vpack.c.bf16 %v201_v8, %v201_v8  ;;  %p541_p2 = scmp.lt.s32.totalorder %s539_s6, %s535_s30 }
  0x30   : > { %p537_p12 = pnand %p536_p6, %p658_p10 }
  0x31   : > { %v210_v11 = vunpack.c.l.b16 %v206_v9  ;;  %v211_v12 = vunpack.c.l.b16 %v207_v10  ;;  %p542_p3 = por %p541_p2, %p540_p0 }
  0x32   : > { %p538_p13 = pneg %p537_p12 }
  0x33   : > { %v212_v13 = vpack.c.b16 %v211_v12, %v210_v11 }
  0x34   : > { %p543_p4 = pnand %p542_p3, %p538_p13 }
  0x35   : > { %426 = vmatmul.msk.bf16.vlgmr.msra.gmra.mxu0 %vm219_vm0, %v212_v13 }
  0xb2   : > { %v232_v15 = vpop.f32.mrf.mxu0 }
  0xb3   : > { %237 = vxpose.xlu0.b32.start [1/2] (short) (narrow) %v232_v15, 8 }
  0xba   : > { %v234_v16 = vpop.f32.mrf.mxu0 }
  0xbb   : > { %238 = vxpose.xlu0.b32.end [2/2] (short) (narrow) %v234_v16, 8 }
 0x157   : > { %v253_v17 = vpop.trf.xlu0 }
 0x158   : > { %v269_v18 = vpack.c.bf16 %v253_v17, %v253_v17 }
 0x15a   : > { %431 = vmatmul.msk.bf16.vlgmr.msra.gmra.mxu1 %vm219_vm0, %v269_v18 }
 0x1d7   : > { %v288_v19 = vpop.f32.mrf.mxu1 }
 0x1d8   : > { %292 = vxpose.xlu1.b32.start.end [1/1] (short) (narrow) %v288_v19, 8 }
 0x1df   : > { %v290_v20 = vpop.f32.mrf.mxu1 }
 0x27c   : > { %v308_v21 = vpop.trf.xlu1 }
 0x27d   : > { %325 = vst.msk [vmem:[%s191_s20] sm:$0xff] %vm324_vm1, %v308_v21 }
 0x27e   : > { %546 = shalt.err (!%p543_p4)
}
 0x27f   : > { %442 = dma.vmem_to_hbm [thread:$0]  (%p658_p10), %s340_s22, 128, %s342_s27, %s327_s26  }
 0x280 PF: > { %p453_p5 = scmp.ge.s32.totalorder %s585_s15, 2  ;;  %s353_s29 = sand.u32 1, %s573_s12  }
 0x281   : > { %s354_s23 = scalar_lea.sflag [#allocation4], %s353_s29 }
 0x282   : > { %p449_p7 = pnand %p453_p5, %p662_p11 }
 0x284   : > { %p450_p8 = pneg %p449_p7 }
 0x286   : > { %568 = dma.done.wait (%p450_p8), %s354_s23, 128  }
 0x287   : > { %570 = vsyncadd (%p450_p8), %s354_s23, 4294967168  ;;  %p16_p9 = scmp.ge.s32.totalorder %s634_s18, 6   ;;  %s750_s12 = smov %s577_s13 }
 0x288   : > { %s751_s13 = smov %s581_s14  ;;  %s752_s14 = smov %s646_s21 }
 0x289   : > { %s753_s15 = smov %s634_s18  ;;  %18 = sbr.rel (!%p16_p9) target bundleno = 5 (0x5), region = 77 }
 0x28e   :  { %360 = vsyncpa [#allocation3], 1 }
 0x28f   :  { %362 = vsyncpa [#allocation3 + $0x1], 1 }
 0x290   :  { %363 = vsyncpa [#allocation4], 1 }
 0x291   :  { %365 = vsyncpa [#allocation4 + $0x1], 1 }

</bundles_post_ra>
